<compile_context>
chip_gen: v5e
topology: v5e:2x2
jax: 0.10.0
libtpu: 0.0.40
codegen_flags: <defaults>
</compile_context>

<pallas_src>
import jax
import jax.numpy as jnp
from jax.experimental import pallas as pl
from jax.experimental.pallas import tpu as pltpu

N_LAYERS = 4
LANE = 128


def _round_up(x, m):
    return pl.cdiv(x, m) * m


def _pad2(a, rows, cols):
    r, c = a.shape
    return jnp.pad(a, ((0, rows - r), (0, cols - c)))


def _mlp_kernel(x_ref, *refs):
    # refs = [w0, t0, w1, t1, w2, t2, w3, t3, w_out, b_out, o_ref]
    o_ref = refs[-1]
    w_out_ref, b_out_ref = refs[-3], refs[-2]

    h = x_ref[...]                                    # (tile_n, d_in) bf16
    for i in range(N_LAYERS):
        w_ref = refs[2 * i]                           # bf16, BN-scale folded
        t_ref = refs[2 * i + 1]                       # f32 shift (1, d_hid_p)
        acc = jnp.dot(h, w_ref[...], preferred_element_type=jnp.float32)
        # BN shift + ReLU in f32 (safe on v5e: no bf16 VALU), carry bf16.
        h = jnp.maximum(acc + t_ref[...], 0.0).astype(jnp.bfloat16)
        # Dropout: identity in eval mode.
    out = jnp.dot(h, w_out_ref[...], preferred_element_type=jnp.float32)
    o_ref[...] = out + b_out_ref[...]                 # true-width f32 store


def _vmem_limit_bytes(tile_n, d_in, d_hid_p, d_out):
    bf16, f32 = 2, 4
    # Weights/shifts are VMEM-resident with constant index_map -> single copy.
    w_bytes = (d_in * d_hid_p + (N_LAYERS - 1) * d_hid_p * d_hid_p
               + d_hid_p * d_out) * bf16
    shift_bytes = (N_LAYERS * d_hid_p + d_out) * f32
    x_tiles = 2 * tile_n * d_in * bf16        # double-buffered bf16 input tiles
    o_tiles = 2 * tile_n * d_out * f32        # double-buffered output tiles
    act = 3 * tile_n * d_hid_p * f32          # live intermediates headroom
    total = w_bytes + shift_bytes + x_tiles + o_tiles + act
    requested = int(total * 1.5) + (4 << 20)  # Mosaic internal scratch headroom

    try:
        vmem_cap = pltpu.get_tpu_info().vmem_capacity_bytes
    except Exception:
        vmem_cap = 64 << 20                   # conservative fallback
    if vmem_cap <= (64 << 20):
        cap = 52 << 20                        # v7x: leave headroom in 64 MiB
    else:
        cap = 100 << 20                       # v5e/v6e: 128 MiB physical
    return int(min(max(requested, 8 << 20), cap))


def enhanced_mlp_pallas(x, params, *, tile_n=None):
    """x: (N, d_input) float (any dtype; streamed as bf16).
    params: folded params from make_params."""
    n, d_in = x.shape
    d_hid = params["w0"].shape[1]
    d_out = params["w_out"].shape[1]
    d_hid_p = _round_up(d_hid, LANE)

    # Derive the batch tile from a VMEM activation budget (few MiB of live
    # f32 intermediates), then clamp to a multiple of 8 sublanes and so that
    # the grid has >=2 balanced steps when the batch allows (v7x megacore).
    if tile_n is None:
        act_budget = 4 << 20
        tile_n = max(256, min(4096, act_budget // (4 * d_hid_p * 4)))
    tile_n = _round_up(max(int(tile_n), 8), 8)
    two_step_cap = max(8, _round_up(pl.cdiv(n, 2), 8))
    tile_n = min(tile_n, two_step_cap)
    grid = (pl.cdiv(n, tile_n),)              # ragged last block handled by Pallas

    # TODO(synk): when the resident bf16 weight set exceeds ~24 MiB (the v7x
    # per-TC budget after tiles/buffers; note each core holds its own copy
    # under 'parallel'), add a hidden-dim grid axis that streams weight tiles
    # instead of keeping all layers VMEM-resident.

    # Input streamed as bf16 (the kernel rounds to bf16 before the first dot
    # anyway); no host-side batch padding, no post-kernel slice.
    x_b = x.astype(jnp.bfloat16)
    flat_inputs = [x_b]
    in_specs = [pl.BlockSpec((tile_n, d_in), lambda i: (i, 0))]

    # Hidden dims padded to lane width (zeros are exact no-ops: padded hidden
    # cols get shift 0 -> ReLU(0)=0, padded weight rows are 0); output kept at
    # true width so the final store/writeback is minimal.
    for li in range(N_LAYERS):
        w = params[f"w{li}"]
        w_p = _pad2(w, d_in if li == 0 else d_hid_p, d_hid_p).astype(jnp.bfloat16)
        t_p = _pad2(params[f"t{li}"], 1, d_hid_p).astype(jnp.float32)
        flat_inputs += [w_p, t_p]
        in_specs += [pl.BlockSpec(w_p.shape, lambda i: (0, 0)),
                     pl.BlockSpec(t_p.shape, lambda i: (0, 0))]
    w_out_p = _pad2(params["w_out"], d_hid_p, d_out).astype(jnp.bfloat16)
    b_out_p = params["b_out"].astype(jnp.float32)
    flat_inputs += [w_out_p, b_out_p]
    in_specs += [pl.BlockSpec(w_out_p.shape, lambda i: (0, 0)),
                 pl.BlockSpec(b_out_p.shape, lambda i: (0, 0))]

    out_spec = pl.BlockSpec((tile_n, d_out), lambda i: (i, 0))

    out = pl.pallas_call(
        _mlp_kernel,
        out_shape=jax.ShapeDtypeStruct((n, d_out), jnp.float32),
        grid_spec=pltpu.PrefetchScalarGridSpec(
            num_scalar_prefetch=0,
            grid=grid,
            in_specs=in_specs,
            out_specs=out_spec,
        ),
        compiler_params=pltpu.CompilerParams(
            dimension_semantics=("parallel",),
            vmem_limit_bytes=_vmem_limit_bytes(tile_n, d_in, d_hid_p, d_out),
        ),
    )(*flat_inputs)

    return out


def make_params(key, d_input, d_hid, d_out):
    """Deterministic params mirroring the PyTorch module (eval mode):
    BN (gamma, beta, running_mean, running_var, eps=1e-5) and the Linear bias
    are folded — the BN scale goes into the weight matrix (stored bf16, in
    (in, out) layout), leaving a single f32 shift per hidden layer."""
    eps = 1e-5
    params = {}
    d_in = d_input
    for i in range(N_LAYERS):
        key, k_w, k_b, k_g, k_be, k_m, k_v = jax.random.split(key, 7)
        w = jax.random.normal(k_w, (d_in, d_hid), jnp.float32) * 0.1
        b = jax.random.normal(k_b, (d_hid,), jnp.float32) * 0.1
        gamma = 1.0 + 0.1 * jax.random.normal(k_g, (d_hid,), jnp.float32)
        beta = 0.1 * jax.random.normal(k_be, (d_hid,), jnp.float32)
        run_mean = 0.1 * jax.random.normal(k_m, (d_hid,), jnp.float32)
        run_var = 1.0 + 0.1 * jax.random.uniform(k_v, (d_hid,), jnp.float32)
        inv_std = gamma / jnp.sqrt(run_var + eps)
        params[f"w{i}"] = (w * inv_std[None, :]).astype(jnp.bfloat16)  # scale folded
        params[f"t{i}"] = ((b - run_mean) * inv_std + beta).reshape(1, d_hid)
        d_in = d_hid
    key, k_w, k_b = jax.random.split(key, 3)
    params["w_out"] = (jax.random.normal(k_w, (d_hid, d_out), jnp.float32) * 0.1
                       ).astype(jnp.bfloat16)
    params["b_out"] = (jax.random.normal(k_b, (d_out,), jnp.float32) * 0.1
                       ).reshape(1, d_out)
    return params


def enhanced_mlp_ref(x, params):
    """Pure-JAX reference with identical (bf16-dot, f32-accumulate) math."""
    h = x.astype(jnp.bfloat16)
    for i in range(N_LAYERS):
        acc = jnp.dot(h, params[f"w{i}"], preferred_element_type=jnp.float32)
        h = jnp.maximum(acc + params[f"t{i}"], 0.0).astype(jnp.bfloat16)
    return (jnp.dot(h, params["w_out"], preferred_element_type=jnp.float32)
            + params["b_out"])


if __name__ == "__main__":
    key = jax.random.PRNGKey(0)
    d_input, d_hid, d_out = 16, 32, 8
    batch = 200   # not a multiple of any tile -> exercises ragged last block

    k_x, k_p = jax.random.split(key)
    x = jax.random.normal(k_x, (batch, d_input), jnp.float32)
    params = make_params(k_p, d_input, d_hid, d_out)
    ref = enhanced_mlp_ref(x, params)

    # Default (VMEM-derived tile, >=2-step grid) ...
    run_auto = jax.jit(lambda x, p: enhanced_mlp_pallas(x, p))
    out_auto = jax.block_until_ready(run_auto(x, params))
    # ... and a small explicit tile to exercise several ragged grid steps.
    run_small = jax.jit(lambda x, p: enhanced_mlp_pallas(x, p, tile_n=64))
    out_small = jax.block_until_ready(run_small(x, params))

    for out in (out_auto, out_small):
        assert out.shape == (batch, d_out)
        assert jnp.allclose(out, ref, atol=1e-3, rtol=1e-3), "mismatch vs reference"
    print("KERNEL_OK")
</pallas_src>

<mosaic_0001>
module attributes {stable_mosaic.version = 11 : i64} {
  func.func @_mlp_kernel(%arg0: i32, %arg1: memref<104x16xbf16, #tpu.memory_space<vmem>>, %arg2: memref<16x128xbf16, #tpu.memory_space<vmem>>, %arg3: memref<1x128xf32, #tpu.memory_space<vmem>>, %arg4: memref<128x128xbf16, #tpu.memory_space<vmem>>, %arg5: memref<1x128xf32, #tpu.memory_space<vmem>>, %arg6: memref<128x128xbf16, #tpu.memory_space<vmem>>, %arg7: memref<1x128xf32, #tpu.memory_space<vmem>>, %arg8: memref<128x128xbf16, #tpu.memory_space<vmem>>, %arg9: memref<1x128xf32, #tpu.memory_space<vmem>>, %arg10: memref<128x8xbf16, #tpu.memory_space<vmem>>, %arg11: memref<1x8xf32, #tpu.memory_space<vmem>>, %arg12: memref<104x8xf32, #tpu.memory_space<vmem>>) attributes {dimension_semantics = [#tpu.dimension_semantics<parallel>], iteration_bounds = array<i64: 2>, scalar_prefetch = 0 : i64, scratch_operands = 0 : i64, tpu.core_type = #tpu.core_type<tc>, window_params = [{transform_indices = @transform_0, window_bounds = array<i64: 104, 16>}, {pipeline_mode = #tpu.pipeline_mode<synchronous>, transform_indices = @transform_1, window_bounds = array<i64: 16, 128>}, {pipeline_mode = #tpu.pipeline_mode<synchronous>, transform_indices = @transform_2, window_bounds = array<i64: 1, 128>}, {pipeline_mode = #tpu.pipeline_mode<synchronous>, transform_indices = @transform_3, window_bounds = array<i64: 128, 128>}, {pipeline_mode = #tpu.pipeline_mode<synchronous>, transform_indices = @transform_4, window_bounds = array<i64: 1, 128>}, {pipeline_mode = #tpu.pipeline_mode<synchronous>, transform_indices = @transform_5, window_bounds = array<i64: 128, 128>}, {pipeline_mode = #tpu.pipeline_mode<synchronous>, transform_indices = @transform_6, window_bounds = array<i64: 1, 128>}, {pipeline_mode = #tpu.pipeline_mode<synchronous>, transform_indices = @transform_7, window_bounds = array<i64: 128, 128>}, {pipeline_mode = #tpu.pipeline_mode<synchronous>, transform_indices = @transform_8, window_bounds = array<i64: 1, 128>}, {pipeline_mode = #tpu.pipeline_mode<synchronous>, transform_indices = @transform_9, window_bounds = array<i64: 128, 8>}, {pipeline_mode = #tpu.pipeline_mode<synchronous>, transform_indices = @transform_10, window_bounds = array<i64: 1, 8>}, {transform_indices = @transform_11, window_bounds = array<i64: 104, 8>}]} {
    %c0 = arith.constant 0 : index
    %c0_0 = arith.constant 0 : index
    %0 = vector.load %arg1[%c0, %c0_0] : memref<104x16xbf16, #tpu.memory_space<vmem>>, vector<104x16xbf16>
    %c0_1 = arith.constant 0 : index
    %c0_2 = arith.constant 0 : index
    %1 = vector.load %arg2[%c0_1, %c0_2] : memref<16x128xbf16, #tpu.memory_space<vmem>>, vector<16x128xbf16>
    %cst = arith.constant dense<0.000000e+00> : vector<104x128xf32>
    %2 = tpu.matmul %0, %1, %cst {dimension_numbers = #tpu.dot_dimension_numbers<[1], [0], [0], [1], [0, 0, 1, 1], [], []>} : vector<104x16xbf16>, vector<16x128xbf16>, vector<104x128xf32> -> vector<104x128xf32>
    %c0_3 = arith.constant 0 : index
    %c0_4 = arith.constant 0 : index
    %3 = vector.load %arg3[%c0_3, %c0_4] : memref<1x128xf32, #tpu.memory_space<vmem>>, vector<1x128xf32>
    %4 = vector.broadcast %3 : vector<1x128xf32> to vector<104x128xf32>
    %5 = arith.addf %2, %4 : vector<104x128xf32>
    %cst_5 = arith.constant 0.000000e+00 : f32
    %6 = vector.broadcast %cst_5 : f32 to vector<104x128xf32>
    %7 = arith.maximumf %5, %6 : vector<104x128xf32>
    %8 = arith.truncf %7 : vector<104x128xf32> to vector<104x128xbf16>
    %c0_6 = arith.constant 0 : index
    %c0_7 = arith.constant 0 : index
    %9 = vector.load %arg4[%c0_6, %c0_7] : memref<128x128xbf16, #tpu.memory_space<vmem>>, vector<128x128xbf16>
    %cst_8 = arith.constant dense<0.000000e+00> : vector<104x128xf32>
    %10 = tpu.matmul %8, %9, %cst_8 {dimension_numbers = #tpu.dot_dimension_numbers<[1], [0], [0], [1], [0, 0, 1, 1], [], []>} : vector<104x128xbf16>, vector<128x128xbf16>, vector<104x128xf32> -> vector<104x128xf32>
    %c0_9 = arith.constant 0 : index
    %c0_10 = arith.constant 0 : index
    %11 = vector.load %arg5[%c0_9, %c0_10] : memref<1x128xf32, #tpu.memory_space<vmem>>, vector<1x128xf32>
    %12 = vector.broadcast %11 : vector<1x128xf32> to vector<104x128xf32>
    %13 = arith.addf %10, %12 : vector<104x128xf32>
    %cst_11 = arith.constant 0.000000e+00 : f32
    %14 = vector.broadcast %cst_11 : f32 to vector<104x128xf32>
    %15 = arith.maximumf %13, %14 : vector<104x128xf32>
    %16 = arith.truncf %15 : vector<104x128xf32> to vector<104x128xbf16>
    %c0_12 = arith.constant 0 : index
    %c0_13 = arith.constant 0 : index
    %17 = vector.load %arg6[%c0_12, %c0_13] : memref<128x128xbf16, #tpu.memory_space<vmem>>, vector<128x128xbf16>
    %cst_14 = arith.constant dense<0.000000e+00> : vector<104x128xf32>
    %18 = tpu.matmul %16, %17, %cst_14 {dimension_numbers = #tpu.dot_dimension_numbers<[1], [0], [0], [1], [0, 0, 1, 1], [], []>} : vector<104x128xbf16>, vector<128x128xbf16>, vector<104x128xf32> -> vector<104x128xf32>
    %c0_15 = arith.constant 0 : index
    %c0_16 = arith.constant 0 : index
    %19 = vector.load %arg7[%c0_15, %c0_16] : memref<1x128xf32, #tpu.memory_space<vmem>>, vector<1x128xf32>
    %20 = vector.broadcast %19 : vector<1x128xf32> to vector<104x128xf32>
    %21 = arith.addf %18, %20 : vector<104x128xf32>
    %cst_17 = arith.constant 0.000000e+00 : f32
    %22 = vector.broadcast %cst_17 : f32 to vector<104x128xf32>
    %23 = arith.maximumf %21, %22 : vector<104x128xf32>
    %24 = arith.truncf %23 : vector<104x128xf32> to vector<104x128xbf16>
    %c0_18 = arith.constant 0 : index
    %c0_19 = arith.constant 0 : index
    %25 = vector.load %arg8[%c0_18, %c0_19] : memref<128x128xbf16, #tpu.memory_space<vmem>>, vector<128x128xbf16>
    %cst_20 = arith.constant dense<0.000000e+00> : vector<104x128xf32>
    %26 = tpu.matmul %24, %25, %cst_20 {dimension_numbers = #tpu.dot_dimension_numbers<[1], [0], [0], [1], [0, 0, 1, 1], [], []>} : vector<104x128xbf16>, vector<128x128xbf16>, vector<104x128xf32> -> vector<104x128xf32>
    %c0_21 = arith.constant 0 : index
    %c0_22 = arith.constant 0 : index
    %27 = vector.load %arg9[%c0_21, %c0_22] : memref<1x128xf32, #tpu.memory_space<vmem>>, vector<1x128xf32>
    %28 = vector.broadcast %27 : vector<1x128xf32> to vector<104x128xf32>
    %29 = arith.addf %26, %28 : vector<104x128xf32>
    %cst_23 = arith.constant 0.000000e+00 : f32
    %30 = vector.broadcast %cst_23 : f32 to vector<104x128xf32>
    %31 = arith.maximumf %29, %30 : vector<104x128xf32>
    %32 = arith.truncf %31 : vector<104x128xf32> to vector<104x128xbf16>
    %c0_24 = arith.constant 0 : index
    %c0_25 = arith.constant 0 : index
    %33 = vector.load %arg10[%c0_24, %c0_25] : memref<128x8xbf16, #tpu.memory_space<vmem>>, vector<128x8xbf16>
    %cst_26 = arith.constant dense<0.000000e+00> : vector<104x8xf32>
    %34 = tpu.matmul %32, %33, %cst_26 {dimension_numbers = #tpu.dot_dimension_numbers<[1], [0], [0], [1], [0, 0, 1, 1], [], []>} : vector<104x128xbf16>, vector<128x8xbf16>, vector<104x8xf32> -> vector<104x8xf32>
    %c0_27 = arith.constant 0 : index
    %c0_28 = arith.constant 0 : index
    %35 = vector.load %arg11[%c0_27, %c0_28] : memref<1x8xf32, #tpu.memory_space<vmem>>, vector<1x8xf32>
    %36 = vector.broadcast %35 : vector<1x8xf32> to vector<104x8xf32>
    %37 = arith.addf %34, %36 : vector<104x8xf32>
    %c0_29 = arith.constant 0 : index
    %c0_30 = arith.constant 0 : index
    %38 = vector.load %arg12[%c0_29, %c0_30] : memref<104x8xf32, #tpu.memory_space<vmem>>, vector<104x8xf32>
    tpu.vector_store %arg12[%c0_29, %c0_30], %37 {strides = array<i32>} : memref<104x8xf32, #tpu.memory_space<vmem>>, vector<104x8xf32>,
    return
  }
  func.func @transform_0(%arg0: i32) -> (i32, i32) {
    %c0_i32 = arith.constant 0 : i32
    %c0_i32_0 = arith.constant 0 : i32
    return %arg0, %c0_i32 : i32, i32
  }
  func.func @transform_1(%arg0: i32) -> (i32, i32) {
    %c0_i32 = arith.constant 0 : i32
    %c0_i32_0 = arith.constant 0 : i32
    %c0_i32_1 = arith.constant 0 : i32
    return %c0_i32, %c0_i32_0 : i32, i32
  }
  func.func @transform_2(%arg0: i32) -> (i32, i32) {
    %c0_i32 = arith.constant 0 : i32
    %c0_i32_0 = arith.constant 0 : i32
    %c0_i32_1 = arith.constant 0 : i32
    return %c0_i32, %c0_i32_0 : i32, i32
  }
  func.func @transform_3(%arg0: i32) -> (i32, i32) {
    %c0_i32 = arith.constant 0 : i32
    %c0_i32_0 = arith.constant 0 : i32
    %c0_i32_1 = arith.constant 0 : i32
    return %c0_i32, %c0_i32_0 : i32, i32
  }
  func.func @transform_4(%arg0: i32) -> (i32, i32) {
    %c0_i32 = arith.constant 0 : i32
    %c0_i32_0 = arith.constant 0 : i32
    %c0_i32_1 = arith.constant 0 : i32
    return %c0_i32, %c0_i32_0 : i32, i32
  }
  func.func @transform_5(%arg0: i32) -> (i32, i32) {
    %c0_i32 = arith.constant 0 : i32
    %c0_i32_0 = arith.constant 0 : i32
    %c0_i32_1 = arith.constant 0 : i32
    return %c0_i32, %c0_i32_0 : i32, i32
  }
  func.func @transform_6(%arg0: i32) -> (i32, i32) {
    %c0_i32 = arith.constant 0 : i32
    %c0_i32_0 = arith.constant 0 : i32
    %c0_i32_1 = arith.constant 0 : i32
    return %c0_i32, %c0_i32_0 : i32, i32
  }
  func.func @transform_7(%arg0: i32) -> (i32, i32) {
    %c0_i32 = arith.constant 0 : i32
    %c0_i32_0 = arith.constant 0 : i32
    %c0_i32_1 = arith.constant 0 : i32
    return %c0_i32, %c0_i32_0 : i32, i32
  }
  func.func @transform_8(%arg0: i32) -> (i32, i32) {
    %c0_i32 = arith.constant 0 : i32
    %c0_i32_0 = arith.constant 0 : i32
    %c0_i32_1 = arith.constant 0 : i32
    return %c0_i32, %c0_i32_0 : i32, i32
  }
  func.func @transform_9(%arg0: i32) -> (i32, i32) {
    %c0_i32 = arith.constant 0 : i32
    %c0_i32_0 = arith.constant 0 : i32
    %c0_i32_1 = arith.constant 0 : i32
    return %c0_i32, %c0_i32_0 : i32, i32
  }
  func.func @transform_10(%arg0: i32) -> (i32, i32) {
    %c0_i32 = arith.constant 0 : i32
    %c0_i32_0 = arith.constant 0 : i32
    %c0_i32_1 = arith.constant 0 : i32
    return %c0_i32, %c0_i32_0 : i32, i32
  }
  func.func @transform_11(%arg0: i32) -> (i32, i32) {
    %c0_i32 = arith.constant 0 : i32
    %c0_i32_0 = arith.constant 0 : i32
    return %arg0, %c0_i32 : i32, i32
  }
}

</mosaic_0001>

<bundles_post_ra>
// kernel: _lambda_.1
= control target key start
LH: loop header
LB: loop body
LE: loop exit
PB: predicated region body
PF: predicated region fallthrough
CT: control target
= control target key end

     0   :  { %s1808_s17 = smov 0   ;;  %s1810_s18 = smov 0   ;;  %s2088_s0 = inlined_call_operand.vmem [shape: bf16[200,16], index: 0, kind: input, shape index: {}]   ;;  %s2089_s1 = inlined_call_operand.vmem [shape: bf16[16,128], index: 1, kind: input, shape index: {}]   ;;  %s2090_s2 = inlined_call_operand.vmem [shape: f32[1,128], index: 2, kind: input, shape index: {}]   ;;  %s2091_s3 = inlined_call_operand.vmem [shape: bf16[128,128], index: 3, kind: input, shape index: {}]   ;;  %s2092_s4 = inlined_call_operand.vmem [shape: f32[1,128], index: 4, kind: input, shape index: {}]   ;;  %s2093_s5 = inlined_call_operand.vmem [shape: bf16[128,128], index: 5, kind: input, shape index: {}]   ;;  %s2094_s6 = inlined_call_operand.vmem [shape: f32[1,128], index: 6, kind: input, shape index: {}]   ;;  %s2095_s7 = inlined_call_operand.vmem [shape: bf16[128,128], index: 7, kind: input, shape index: {}]   ;;  %s2096_s8 = inlined_call_operand.vmem [shape: f32[1,128], index: 8, kind: input, shape index: {}]   ;;  %s2097_s9 = inlined_call_operand.vmem [shape: bf16[128,8], index: 9, kind: input, shape index: {}]   ;;  %s2098_s10 = inlined_call_operand.vmem [shape: f32[1,8], index: 10, kind: input, shape index: {}]   ;;  %s2099_s11 = inlined_call_operand.vmem [shape: f32[200,8], index: 11, kind: output, shape index: {}]  }
   0x1   :  { %s1812_s19 = smov 0  }
   0x2 LB: > { %s1821_s20 = sadd.s32 4294967295, %s1714_s19   ;;  %s1823_s21 = sadd.s32 1, %s1714_s19   ;;  %s1714_s19 = sphi %s1812_s19, %s2108_s19   ;;  %s1710_s18 = sphi %s1810_s18, %s2107_s18   ;;  %s1706_s17 = sphi %s1808_s17, %s2106_s17  }
   0x3   : > { %s261_s22 = ssub.s32 %s1714_s19, %s1823_s21  ;;  %s264_s23 = sadd.s32 1, %s1710_s18 }
   0x4   : > { %p262_p0 = scmp.eq.s32.totalorder %s261_s22, 0  ;;  %p274_p1 = scmp.ne.s32.totalorder %s1710_s18, %s1706_s17 }
   0x5   : > { %p275_p2 = scmp.eq.s32.totalorder %s1821_s20, 1  ;;  %p1339_p3 = scmp.ge.s32.totalorder %s1714_s19, 1 }
   0x6   : > { %s1831_s24 = scalar_select %p262_p0, %s1710_s18, %s264_s23  }
   0x7   : > { %p1833_p4 = por %p275_p2, %p274_p1  ;;  %p346_p5 = scmp.lt.s32.totalorder %s1714_s19, 3 }
   0x9   : > { %p347_p6 = pnand %p1339_p3, %p346_p5 }
   0xa   : > { %s1841_s28 = smul.u32 (!%p347_p6), 13, %s1821_s20 }
   0xb   : > { %350 = sbr.rel (%p347_p6) target bundleno = 883 (0x373), region = 64 }
   0xc   : > { %p394_p7 = scmp.lt.s32.totalorder (!%p347_p6), %s1841_s28, 24 }
  0x10   : > { %v1522_v0 = vld [vmem:[%s2089_s1] sm:$0xff]  ;;  %v1530_v1 = vld [vmem:[%s2091_s3 + $0x38] sm:$0xff]  ;;  %v1529_v2 = vld [vmem:[%s2091_s3 + $0x30] sm:$0xff]  ;;  %s395_s14 = scalar_select %p394_p7, %s1841_s28, 24  ;;  %vm467_vm0 = vcmask 130048   ;;  %vm1056_vm1 = vcmask 64512  }
  0x11   : > { %496 = vmatpush.bf16.msra.mxu0 %v1522_v0  ;;  %1556 = vmatpush.bf16.msra.mxu1 %v1522_v0  ;;  %v1528_v3 = vld [vmem:[%s2091_s3 + $0x28] sm:$0xff]  ;;  %v1527_v9 = vld [vmem:[%s2091_s3 + $0x20] sm:$0xff]  ;;  %v1526_v11 = vld [vmem:[%s2091_s3 + $0x18] sm:$0xff]  ;;  %s1555_s26 = smul.u32 (%p1833_p4), 104, %s1821_s20 }
  0x12   : > { %1557 = vmatpush.bf16.msra.mxu2 %v1522_v0  ;;  %1558 = vmatpush.bf16.msra.mxu3 %v1522_v0  ;;  %s1340_s15 = sshll.u32 %s395_s14, 2  ;;  %v1525_v15 = vld [vmem:[%s2091_s3 + $0x10] sm:$0xff]  ;;  %v1524_v16 = vld [vmem:[%s2091_s3 + $0x8] sm:$0xff]  ;;  %v1523_v17 = vld [vmem:[%s2091_s3] sm:$0xff] }
  0x13   : > { %s397_s22 = scalar_lea.vmem %s2088_s0, %s1340_s15  ;;  %v1649_v19 = vld [vmem:[%s2090_s2] ss:$0 sm:$0xff]  ;;  %v1538_v50 = vld [vmem:[%s2093_s5 + $0x38] sm:$0xff]  ;;  %v1537_v58 = vld [vmem:[%s2093_s5 + $0x30] sm:$0xff]  ;;  %s386_s15 = sand.u32 1, %s1706_s17  }
  0x14   : > { %v1516_v4 = vld [vmem:[%s397_s22] sm:$0xff]  ;;  %v1518_v5 = vld [vmem:[%s397_s22 + $0x10] sm:$0xff]  ;;  %v1517_v12 = vld [vmem:[%s397_s22 + $0x8] sm:$0xff]  ;;  %s1559_s16 = smul.u32 104, %s386_s15  ;;  %s1078_s17 = ssub.s32 (%p1833_p4), 25, %s1841_s28 }
  0x15   : > { %620 = vmatpush.bf16.msrb.mxu1 %v1530_v1  ;;  %v1520_v6 = vld [vmem:[%s397_s22 + $0x20] sm:$0xff]  ;;  %1369 = vmatmul.msk.bf16.vlgmr.msra.gmra.mxu0 %vm467_vm0, %v1516_v4  ;;  %v421_v7 = vld [vmem:[%s397_s22 + $0x30] sm:$0xf]  ;;  %v1519_v13 = vld [vmem:[%s397_s22 + $0x18] sm:$0xff]  ;;  %p1079_p8 = scmp.lt.s32.totalorder (%p1833_p4), %s1078_s17, 13  ;;  %s2002_s30 = scalar_lea.vmem (%p1833_p4), %s2099_s11, %s1555_s26  }
  0x16   : > { %1371 = vmatmul.msk.bf16.vlgmr.msra.gmra.mxu1 %vm467_vm0, %v1518_v5  ;;  %1373 = vmatmul.msk.bf16.vlgmr.msra.gmra.mxu2 %vm467_vm0, %v1520_v6  ;;  %v453_v8 = vunpack.c.l.b16 %v421_v7  ;;  %v1521_v14 = vld [vmem:[%s397_s22 + $0x28] sm:$0xff]  ;;  %v1535_v63 = vld [vmem:[%s2093_s5 + $0x20] sm:$0xff]  ;;  %v1533_v7 = vld [vmem:[%s2093_s5 + $0x10] sm:$0xff]  ;;  %s1967_s22 = scalar_lea.vmem [#allocation2], %s1559_s16  }
  0x17   : > { %751 = vmatpush.bf16.msrb.mxu2 %v1538_v50  ;;  %v1536_v59 = vld [vmem:[%s2093_s5 + $0x28] sm:$0xff] }
  0x18   : > { %v460_v10 = vpack.c.b16 %v453_v8, %v453_v8  ;;  %v1532_v8 = vld [vmem:[%s2093_s5 + $0x8] sm:$0xff] }
  0x19   : > { %621 = vmatpush.bf16.msrb.mxu1 %v1529_v2  ;;  %v1534_v2 = vld [vmem:[%s2093_s5 + $0x18] sm:$0xff] }
  0x1a   : > { %1375 = vmatmul.msk.bf16.vlgmr.msra.gmra.mxu3 %vm467_vm0, %v460_v10 }
  0x1b   : > { %752 = vmatpush.bf16.msrb.mxu2 %v1537_v58 }
  0x1d   : > { %622 = vmatpush.bf16.msrb.mxu1 %v1528_v3 }
  0x1f   : > { %753 = vmatpush.bf16.msrb.mxu2 %v1536_v59 }
  0x21   : > { %623 = vmatpush.bf16.msrb.mxu1 %v1527_v9  ;;  %v1531_v9 = vld [vmem:[%s2093_s5] sm:$0xff] }
  0x23   : > { %754 = vmatpush.bf16.msrb.mxu2 %v1535_v63  ;;  %v1541_v63 = vld [vmem:[%s2095_s7 + $0x10] sm:$0xff] }
  0x25   : > { %624 = vmatpush.bf16.msrb.mxu1 %v1526_v11  ;;  %1370 = vmatmul.msk.bf16.gmra.mxu0 %vm467_vm0, %v1517_v12  ;;  %v1650_v11 = vld [vmem:[%s2092_s4] ss:$0 sm:$0xff] }
  0x26   : > { %1372 = vmatmul.msk.bf16.gmra.mxu1 %vm467_vm0, %v1519_v13  ;;  %1374 = vmatmul.msk.bf16.gmra.mxu2 %vm467_vm0, %v1521_v14 }
  0x27   : > { %755 = vmatpush.bf16.msrb.mxu2 %v1534_v2 }
  0x29   : > { %625 = vmatpush.bf16.msrb.mxu1 %v1525_v15 }
  0x2b   : > { %756 = vmatpush.bf16.msrb.mxu2 %v1533_v7 }
  0x2d   : > { %626 = vmatpush.bf16.msrb.mxu1 %v1524_v16 }
  0x2f   : > { %757 = vmatpush.bf16.msrb.mxu2 %v1532_v8 }
  0x31   : > { %627 = vmatpush.bf16.msrb.mxu1 %v1523_v17 }
  0x33   : > { %758 = vmatpush.bf16.msrb.mxu2 %v1531_v9 }
  0x92   : > { %v498_v18 = vpop.f32.mrf.mxu0 }
  0x93   : > { %v499_v20 = vadd.f32 %v1649_v19, %v498_v18  ;;  %v508_v27 = vpop.f32.mrf.mxu1 }
  0x94   : > { %v509_v35 = vadd.f32 %v1649_v19, %v508_v27 }
  0x95   : > { %v532_v23 = vmax.f32 %v499_v20, 0.0 }
  0x96   : > { %v536_v38 = vmax.f32 %v509_v35, 0.0 }
  0x99   : > { %v518_v42 = vpop.f32.mrf.mxu2 }
  0x9a   : > { %v500_v21 = vpop.f32.mrf.mxu0  ;;  %v519_v51 = vadd.f32 %v1649_v19, %v518_v42 }
  0x9b   : > { %v501_v22 = vadd.f32 %v1649_v19, %v500_v21  ;;  %v510_v34 = vpop.f32.mrf.mxu1 }
  0x9c   : > { %v511_v36 = vadd.f32 %v1649_v19, %v510_v34  ;;  %v540_v55 = vmax.f32 %v519_v51, 0.0 }
  0x9d   : > { %v533_v24 = vmax.f32 %v501_v22, 0.0  ;;  %v528_v49 = vpop.f32.mrf.mxu3 }
  0x9e   : > { %v537_v39 = vmax.f32 %v511_v36, 0.0  ;;  %v529_v4 = vadd.f32 %v1649_v19, %v528_v49  ;;  %v1544_v49 = vld [vmem:[%s2095_s7 + $0x28] sm:$0xff] }
  0x9f   : > { %v545_v25 = vpack.c.bf16 %v533_v24, %v532_v23 }
  0xa0   : > { %v547_v40 = vpack.c.bf16 %v537_v39, %v536_v38  ;;  %v544_v5 = vmax.f32 %v529_v4, 0.0 }
  0xa1   : > { %628 = vmatmul.bf16.vlgmr.msrb.gmra.mxu1 %v545_v25  ;;  %v520_v48 = vpop.f32.mrf.mxu2 }
  0xa2   : > { %v503_v26 = vpop.f32.mrf.mxu0  ;;  %v521_v52 = vadd.f32 %v1649_v19, %v520_v48  ;;  %v551_v6 = vpack.c.bf16 %v544_v5, %v544_v5  ;;  %v1545_v48 = vld [vmem:[%s2095_s7 + $0x30] sm:$0xff] }
  0xa3   : > { %v504_v28 = vadd.f32 %v1649_v19, %v503_v26  ;;  %v513_v37 = vpop.f32.mrf.mxu1 }
  0xa4   : > { %v514_v43 = vadd.f32 %v1649_v19, %v513_v37  ;;  %v541_v56 = vmax.f32 %v521_v52, 0.0 }
  0xa5   : > { %v534_v31 = vmax.f32 %v504_v28, 0.0  ;;  %v530_v53 = vpop.f32.mrf.mxu3 }
  0xa6   : > { %v538_v45 = vmax.f32 %v514_v43, 0.0  ;;  %v549_v57 = vpack.c.bf16 %v541_v56, %v540_v55  ;;  %v1543_v53 = vld [vmem:[%s2095_s7 + $0x20] sm:$0xff] }
  0xa9   : > { %v523_v54 = vpop.f32.mrf.mxu2 }
  0xaa   : > { %v505_v29 = vpop.f32.mrf.mxu0  ;;  %v524_v61 = vadd.f32 %v1649_v19, %v523_v54 }
  0xab   : > { %v506_v30 = vadd.f32 %v1649_v19, %v505_v29  ;;  %v515_v41 = vpop.f32.mrf.mxu1 }
  0xac   : > { %v516_v44 = vadd.f32 %v1649_v19, %v515_v41  ;;  %v542_v0 = vmax.f32 %v524_v61, 0.0 }
  0xad   : > { %v535_v32 = vmax.f32 %v506_v30, 0.0 }
  0xae   : > { %v539_v46 = vmax.f32 %v516_v44, 0.0 }
  0xaf   : > { %v546_v33 = vpack.c.bf16 %v535_v32, %v534_v31 }
  0xb0   : > { %v548_v47 = vpack.c.bf16 %v539_v46, %v538_v45  ;;  %v1546_v46 = vld [vmem:[%s2095_s7 + $0x38] sm:$0xff] }
  0xb1   : > { %633 = vmatmul.bf16.gmra.mxu1 %v546_v33  ;;  %v525_v60 = vpop.f32.mrf.mxu2  ;;  %882 = vmatpush.bf16.msrb.mxu3 %v1546_v46 }
  0xb2   : > { %v526_v62 = vadd.f32 %v1649_v19, %v525_v60 }
  0xb4   : > { %v543_v1 = vmax.f32 %v526_v62, 0.0  ;;  %v1542_v62 = vld [vmem:[%s2095_s7 + $0x18] sm:$0xff] }
  0xb5   : > { %883 = vmatpush.bf16.msrb.mxu3 %v1545_v48 }
  0xb6   : > { %v550_v3 = vpack.c.bf16 %v543_v1, %v542_v0  ;;  %v1540_v0 = vld [vmem:[%s2095_s7 + $0x8] sm:$0xff]  ;;  %v1539_v1 = vld [vmem:[%s2095_s7] sm:$0xff] }
  0xb9   : > { %884 = vmatpush.bf16.msrb.mxu3 %v1544_v49  ;;  %v1550_v49 = vld [vmem:[%s2097_s9 + $0x18] sm:$0xff] }
  0xbd   : > { %885 = vmatpush.bf16.msrb.mxu3 %v1543_v53 }
  0xc1   : > { %638 = vmatmul.bf16.gmra.mxu1 %v547_v40  ;;  %886 = vmatpush.bf16.msrb.mxu3 %v1542_v62 }
  0xc5   : > { %887 = vmatpush.bf16.msrb.mxu3 %v1541_v63 }
  0xc9   : > { %888 = vmatpush.bf16.msrb.mxu3 %v1540_v0 }
  0xcd   : > { %889 = vmatpush.bf16.msrb.mxu3 %v1539_v1 }
  0xd1   : > { %643 = vmatmul.bf16.gmra.mxu1 %v548_v47 }
  0xe1   : > { %648 = vmatmul.bf16.gmra.mxu1 %v549_v57 }
  0xf1   : > { %653 = vmatmul.bf16.gmra.mxu1 %v550_v3  ;;  %v1651_v3 = vld [vmem:[%s2094_s6] ss:$0 sm:$0xff] }
 0x101   : > { %658 = vmatmul.bf16.gmra.mxu1 %v551_v6 }
 0x11e   : > { %v629_v10 = vpop.f32.mrf.mxu1 }
 0x11f   : > { %v630_v12 = vadd.f32 %v1650_v11, %v629_v10 }
 0x121   : > { %v663_v15 = vmax.f32 %v630_v12, 0.0 }
 0x126   : > { %v631_v13 = vpop.f32.mrf.mxu1 }
 0x127   : > { %v632_v14 = vadd.f32 %v1650_v11, %v631_v13 }
 0x129   : > { %v664_v16 = vmax.f32 %v632_v14, 0.0 }
 0x12b   : > { %v676_v17 = vpack.c.bf16 %v664_v16, %v663_v15 }
 0x12d   : > { %759 = vmatmul.bf16.vlgmr.msrb.gmra.mxu2 %v676_v17 }
 0x12e   : > { %v634_v18 = vpop.f32.mrf.mxu1 }
 0x12f   : > { %v635_v19 = vadd.f32 %v1650_v11, %v634_v18 }
 0x131   : > { %v665_v22 = vmax.f32 %v635_v19, 0.0 }
 0x136   : > { %v636_v20 = vpop.f32.mrf.mxu1 }
 0x137   : > { %v637_v21 = vadd.f32 %v1650_v11, %v636_v20 }
 0x139   : > { %v666_v23 = vmax.f32 %v637_v21, 0.0 }
 0x13b   : > { %v677_v24 = vpack.c.bf16 %v666_v23, %v665_v22 }
 0x13d   : > { %764 = vmatmul.bf16.gmra.mxu2 %v677_v24 }
 0x13e   : > { %v639_v25 = vpop.f32.mrf.mxu1 }
 0x13f   : > { %v640_v26 = vadd.f32 %v1650_v11, %v639_v25 }
 0x141   : > { %v667_v29 = vmax.f32 %v640_v26, 0.0 }
 0x146   : > { %v641_v27 = vpop.f32.mrf.mxu1 }
 0x147   : > { %v642_v28 = vadd.f32 %v1650_v11, %v641_v27 }
 0x149   : > { %v668_v30 = vmax.f32 %v642_v28, 0.0 }
 0x14b   : > { %v678_v31 = vpack.c.bf16 %v668_v30, %v667_v29 }
 0x14d   : > { %769 = vmatmul.bf16.gmra.mxu2 %v678_v31 }
 0x14e   : > { %v644_v32 = vpop.f32.mrf.mxu1 }
 0x14f   : > { %v645_v33 = vadd.f32 %v1650_v11, %v644_v32 }
 0x151   : > { %v669_v36 = vmax.f32 %v645_v33, 0.0 }
 0x156   : > { %v646_v34 = vpop.f32.mrf.mxu1 }
 0x157   : > { %v647_v35 = vadd.f32 %v1650_v11, %v646_v34 }
 0x159   : > { %v670_v37 = vmax.f32 %v647_v35, 0.0 }
 0x15b   : > { %v679_v38 = vpack.c.bf16 %v670_v37, %v669_v36 }
 0x15d   : > { %774 = vmatmul.bf16.gmra.mxu2 %v679_v38  ;;  %v1554_v38 = vld [vmem:[%s2097_s9 + $0x38] sm:$0xff] }
 0x15e   : > { %v649_v39 = vpop.f32.mrf.mxu1  ;;  %1013 = vmatpush.bf16.msrb.mxu0 %v1554_v38 }
 0x15f   : > { %v650_v40 = vadd.f32 %v1650_v11, %v649_v39 }
 0x161   : > { %v671_v43 = vmax.f32 %v650_v40, 0.0  ;;  %v1553_v40 = vld [vmem:[%s2097_s9 + $0x30] sm:$0xff] }
 0x162   : > { %1014 = vmatpush.bf16.msrb.mxu0 %v1553_v40 }
 0x166   : > { %v651_v41 = vpop.f32.mrf.mxu1 }
 0x167   : > { %v652_v42 = vadd.f32 %v1650_v11, %v651_v41  ;;  %v1552_v41 = vld [vmem:[%s2097_s9 + $0x28] sm:$0xff] }
 0x168   : > { %1015 = vmatpush.bf16.msrb.mxu0 %v1552_v41 }
 0x169   : > { %v672_v44 = vmax.f32 %v652_v42, 0.0 }
 0x16b   : > { %v680_v45 = vpack.c.bf16 %v672_v44, %v671_v43 }
 0x16d   : > { %779 = vmatmul.bf16.gmra.mxu2 %v680_v45  ;;  %v1551_v45 = vld [vmem:[%s2097_s9 + $0x20] sm:$0xff] }
 0x16e   : > { %v654_v47 = vpop.f32.mrf.mxu1  ;;  %1016 = vmatpush.bf16.msrb.mxu0 %v1551_v45 }
 0x16f   : > { %v655_v50 = vadd.f32 %v1650_v11, %v654_v47 }
 0x171   : > { %v673_v54 = vmax.f32 %v655_v50, 0.0 }
 0x172   : > { %1017 = vmatpush.bf16.msrb.mxu0 %v1550_v49 }
 0x176   : > { %v656_v51 = vpop.f32.mrf.mxu1 }
 0x177   : > { %v657_v52 = vadd.f32 %v1650_v11, %v656_v51 }
 0x179   : > { %v674_v55 = vmax.f32 %v657_v52, 0.0 }
 0x17b   : > { %v681_v56 = vpack.c.bf16 %v674_v55, %v673_v54  ;;  %v1549_v55 = vld [vmem:[%s2097_s9 + $0x10] sm:$0xff] }
 0x17c   : > { %1018 = vmatpush.bf16.msrb.mxu0 %v1549_v55 }
 0x17d   : > { %784 = vmatmul.bf16.gmra.mxu2 %v681_v56  ;;  %v1548_v56 = vld [vmem:[%s2097_s9 + $0x8] sm:$0xff] }
 0x17e   : > { %v659_v57 = vpop.f32.mrf.mxu1 }
 0x17f   : > { %v660_v58 = vadd.f32 %v1650_v11, %v659_v57  ;;  %v1547_v57 = vld [vmem:[%s2097_s9] sm:$0xff] }
 0x180   : > { %1019 = vmatpush.bf16.msrb.mxu0 %v1548_v56 }
 0x181   : > { %v675_v59 = vmax.f32 %v660_v58, 0.0 }
 0x183   : > { %v682_v61 = vpack.c.bf16 %v675_v59, %v675_v59  ;;  %v1652_v59 = vld [vmem:[%s2096_s8] ss:$0 sm:$0xff] }
 0x184   : > { %1020 = vmatpush.bf16.msrb.mxu0 %v1547_v57 }
 0x186   : > { %v661_v60 = vpop.f32.mrf.mxu1 }
 0x18d   : > { %789 = vmatmul.bf16.gmra.mxu2 %v682_v61 }
 0x1b0   : > { %v760_v2 = vpop.f32.mrf.mxu2 }
 0x1b1   : > { %v761_v4 = vadd.f32 %v1651_v3, %v760_v2 }
 0x1b3   : > { %v794_v7 = vmax.f32 %v761_v4, 0.0 }
 0x1b8   : > { %v762_v5 = vpop.f32.mrf.mxu2 }
 0x1b9   : > { %v763_v6 = vadd.f32 %v1651_v3, %v762_v5 }
 0x1bb   : > { %v795_v8 = vmax.f32 %v763_v6, 0.0 }
 0x1bd   : > { %v807_v9 = vpack.c.bf16 %v795_v8, %v794_v7 }
 0x1bf   : > { %890 = vmatmul.bf16.vlgmr.msrb.gmra.mxu3 %v807_v9 }
 0x1c0   : > { %v765_v10 = vpop.f32.mrf.mxu2 }
 0x1c1   : > { %v766_v11 = vadd.f32 %v1651_v3, %v765_v10 }
 0x1c3   : > { %v796_v14 = vmax.f32 %v766_v11, 0.0 }
 0x1c8   : > { %v767_v12 = vpop.f32.mrf.mxu2 }
 0x1c9   : > { %v768_v13 = vadd.f32 %v1651_v3, %v767_v12 }
 0x1cb   : > { %v797_v15 = vmax.f32 %v768_v13, 0.0 }
 0x1cd   : > { %v808_v16 = vpack.c.bf16 %v797_v15, %v796_v14 }
 0x1cf   : > { %895 = vmatmul.bf16.gmra.mxu3 %v808_v16 }
 0x1d0   : > { %v770_v17 = vpop.f32.mrf.mxu2 }
 0x1d1   : > { %v771_v18 = vadd.f32 %v1651_v3, %v770_v17 }
 0x1d3   : > { %v798_v21 = vmax.f32 %v771_v18, 0.0 }
 0x1d8   : > { %v772_v19 = vpop.f32.mrf.mxu2 }
 0x1d9   : > { %v773_v20 = vadd.f32 %v1651_v3, %v772_v19 }
 0x1db   : > { %v799_v22 = vmax.f32 %v773_v20, 0.0 }
 0x1dd   : > { %v809_v23 = vpack.c.bf16 %v799_v22, %v798_v21 }
 0x1df   : > { %900 = vmatmul.bf16.gmra.mxu3 %v809_v23 }
 0x1e0   : > { %v775_v24 = vpop.f32.mrf.mxu2 }
 0x1e1   : > { %v776_v25 = vadd.f32 %v1651_v3, %v775_v24 }
 0x1e3   : > { %v800_v28 = vmax.f32 %v776_v25, 0.0 }
 0x1e8   : > { %v777_v26 = vpop.f32.mrf.mxu2 }
 0x1e9   : > { %v778_v27 = vadd.f32 %v1651_v3, %v777_v26 }
 0x1eb   : > { %v801_v29 = vmax.f32 %v778_v27, 0.0 }
 0x1ed   : > { %v810_v30 = vpack.c.bf16 %v801_v29, %v800_v28 }
 0x1ef   : > { %905 = vmatmul.bf16.gmra.mxu3 %v810_v30 }
 0x1f0   : > { %v780_v31 = vpop.f32.mrf.mxu2 }
 0x1f1   : > { %v781_v32 = vadd.f32 %v1651_v3, %v780_v31 }
 0x1f3   : > { %v802_v35 = vmax.f32 %v781_v32, 0.0 }
 0x1f8   : > { %v782_v33 = vpop.f32.mrf.mxu2 }
 0x1f9   : > { %v783_v34 = vadd.f32 %v1651_v3, %v782_v33 }
 0x1fb   : > { %v803_v36 = vmax.f32 %v783_v34, 0.0 }
 0x1fd   : > { %v811_v37 = vpack.c.bf16 %v803_v36, %v802_v35 }
 0x1ff   : > { %910 = vmatmul.bf16.gmra.mxu3 %v811_v37 }
 0x200   : > { %v785_v39 = vpop.f32.mrf.mxu2 }
 0x201   : > { %v786_v42 = vadd.f32 %v1651_v3, %v785_v39 }
 0x203   : > { %v804_v46 = vmax.f32 %v786_v42, 0.0  ;;  %v1653_v42 = vld [vmem:[%s2098_s10] ss:$0 sm:$0xff] }
 0x208   : > { %v787_v43 = vpop.f32.mrf.mxu2 }
 0x209   : > { %v788_v44 = vadd.f32 %v1651_v3, %v787_v43 }
 0x20b   : > { %v805_v47 = vmax.f32 %v788_v44, 0.0 }
 0x20d   : > { %v812_v48 = vpack.c.bf16 %v805_v47, %v804_v46 }
 0x20f   : > { %915 = vmatmul.bf16.gmra.mxu3 %v812_v48 }
 0x210   : > { %v790_v50 = vpop.f32.mrf.mxu2 }
 0x211   : > { %v791_v51 = vadd.f32 %v1651_v3, %v790_v50 }
 0x213   : > { %v806_v52 = vmax.f32 %v791_v51, 0.0 }
 0x215   : > { %v813_v54 = vpack.c.bf16 %v806_v52, %v806_v52 }
 0x218   : > { %v792_v53 = vpop.f32.mrf.mxu2 }
 0x21f   : > { %920 = vmatmul.bf16.gmra.mxu3 %v813_v54 }
 0x242   : > { %v891_v58 = vpop.f32.mrf.mxu3 }
 0x243   : > { %v892_v60 = vadd.f32 %v1652_v59, %v891_v58 }
 0x245   : > { %v925_v63 = vmax.f32 %v892_v60, 0.0 }
 0x24a   : > { %v893_v61 = vpop.f32.mrf.mxu3 }
 0x24b   : > { %v894_v62 = vadd.f32 %v1652_v59, %v893_v61 }
 0x24d   : > { %v926_v0 = vmax.f32 %v894_v62, 0.0 }
 0x24f   : > { %v938_v1 = vpack.c.bf16 %v926_v0, %v925_v63 }
 0x251   : > { %1021 = vmatmul.bf16.vlgmr.msrb.gmra.mxu0 %v938_v1 }
 0x252   : > { %v896_v2 = vpop.f32.mrf.mxu3 }
 0x253   : > { %v897_v3 = vadd.f32 %v1652_v59, %v896_v2 }
 0x255   : > { %v927_v6 = vmax.f32 %v897_v3, 0.0 }
 0x25a   : > { %v898_v4 = vpop.f32.mrf.mxu3 }
 0x25b   : > { %v899_v5 = vadd.f32 %v1652_v59, %v898_v4 }
 0x25d   : > { %v928_v7 = vmax.f32 %v899_v5, 0.0 }
 0x25f   : > { %v939_v8 = vpack.c.bf16 %v928_v7, %v927_v6 }
 0x261   : > { %1026 = vmatmul.bf16.gmra.mxu0 %v939_v8 }
 0x262   : > { %v901_v9 = vpop.f32.mrf.mxu3 }
 0x263   : > { %v902_v10 = vadd.f32 %v1652_v59, %v901_v9 }
 0x265   : > { %v929_v13 = vmax.f32 %v902_v10, 0.0 }
 0x26a   : > { %v903_v11 = vpop.f32.mrf.mxu3 }
 0x26b   : > { %v904_v12 = vadd.f32 %v1652_v59, %v903_v11 }
 0x26d   : > { %v930_v14 = vmax.f32 %v904_v12, 0.0 }
 0x26f   : > { %v940_v15 = vpack.c.bf16 %v930_v14, %v929_v13 }
 0x271   : > { %1031 = vmatmul.bf16.gmra.mxu0 %v940_v15 }
 0x272   : > { %v906_v16 = vpop.f32.mrf.mxu3 }
 0x273   : > { %v907_v17 = vadd.f32 %v1652_v59, %v906_v16 }
 0x275   : > { %v931_v20 = vmax.f32 %v907_v17, 0.0 }
 0x27a   : > { %v908_v18 = vpop.f32.mrf.mxu3 }
 0x27b   : > { %v909_v19 = vadd.f32 %v1652_v59, %v908_v18 }
 0x27d   : > { %v932_v21 = vmax.f32 %v909_v19, 0.0 }
 0x27f   : > { %v941_v22 = vpack.c.bf16 %v932_v21, %v931_v20 }
 0x281   : > { %1036 = vmatmul.bf16.gmra.mxu0 %v941_v22 }
 0x282   : > { %v911_v23 = vpop.f32.mrf.mxu3 }
 0x283   : > { %v912_v24 = vadd.f32 %v1652_v59, %v911_v23 }
 0x285   : > { %v933_v27 = vmax.f32 %v912_v24, 0.0 }
 0x28a   : > { %v913_v25 = vpop.f32.mrf.mxu3 }
 0x28b   : > { %v914_v26 = vadd.f32 %v1652_v59, %v913_v25 }
 0x28d   : > { %v934_v28 = vmax.f32 %v914_v26, 0.0 }
 0x28f   : > { %v942_v29 = vpack.c.bf16 %v934_v28, %v933_v27 }
 0x291   : > { %1041 = vmatmul.bf16.gmra.mxu0 %v942_v29 }
 0x292   : > { %v916_v30 = vpop.f32.mrf.mxu3 }
 0x293   : > { %v917_v31 = vadd.f32 %v1652_v59, %v916_v30 }
 0x295   : > { %v935_v34 = vmax.f32 %v917_v31, 0.0 }
 0x29a   : > { %v918_v32 = vpop.f32.mrf.mxu3 }
 0x29b   : > { %v919_v33 = vadd.f32 %v1652_v59, %v918_v32 }
 0x29d   : > { %v936_v35 = vmax.f32 %v919_v33, 0.0 }
 0x29f   : > { %v943_v36 = vpack.c.bf16 %v936_v35, %v935_v34 }
 0x2a1   : > { %1046 = vmatmul.bf16.gmra.mxu0 %v943_v36 }
 0x2a2   : > { %v921_v37 = vpop.f32.mrf.mxu3 }
 0x2a3   : > { %v922_v38 = vadd.f32 %v1652_v59, %v921_v37 }
 0x2a5   : > { %v937_v39 = vmax.f32 %v922_v38, 0.0 }
 0x2a7   : > { %v944_v41 = vpack.c.bf16 %v937_v39, %v937_v39 }
 0x2aa   : > { %v923_v40 = vpop.f32.mrf.mxu3 }
 0x2b1   : > { %1051 = vmatmul.bf16.gmra.mxu0 %v944_v41 }
 0x2ce   : > { %v1022_v43 = vpop.f32.mrf.mxu0 }
 0x2cf   : > { %v1023_v44 = vadd.f32 %v1653_v42, %v1022_v43 }
 0x2d1   : > { %1057 = vst.msk [vmem:[%s1967_s22] sm:$0xff] %vm1056_vm1, %v1023_v44 }
 0x2d6   : > { %v1024_v45 = vpop.f32.mrf.mxu0 }
 0x2d7   : > { %v1025_v46 = vadd.f32 %v1653_v42, %v1024_v45 }
 0x2d9   : > { %1058 = vst.msk [vmem:[%s1967_s22 + $0x8] sm:$0xff] %vm1056_vm1, %v1025_v46 }
 0x2de   : > { %v1027_v47 = vpop.f32.mrf.mxu0 }
 0x2df   : > { %v1028_v48 = vadd.f32 %v1653_v42, %v1027_v47 }
 0x2e1   : > { %1059 = vst.msk [vmem:[%s1967_s22 + $0x10] sm:$0xff] %vm1056_vm1, %v1028_v48 }
 0x2e6   : > { %v1029_v49 = vpop.f32.mrf.mxu0 }
 0x2e7   : > { %v1030_v50 = vadd.f32 %v1653_v42, %v1029_v49 }
 0x2e9   : > { %1060 = vst.msk [vmem:[%s1967_s22 + $0x18] sm:$0xff] %vm1056_vm1, %v1030_v50 }
 0x2ee   : > { %v1032_v51 = vpop.f32.mrf.mxu0 }
 0x2ef   : > { %v1033_v52 = vadd.f32 %v1653_v42, %v1032_v51 }
 0x2f1   : > { %1061 = vst.msk [vmem:[%s1967_s22 + $0x20] sm:$0xff] %vm1056_vm1, %v1033_v52 }
 0x2f6   : > { %v1034_v53 = vpop.f32.mrf.mxu0 }
 0x2f7   : > { %v1035_v54 = vadd.f32 %v1653_v42, %v1034_v53 }
 0x2f9   : > { %1062 = vst.msk [vmem:[%s1967_s22 + $0x28] sm:$0xff] %vm1056_vm1, %v1035_v54 }
 0x2fe   : > { %v1037_v55 = vpop.f32.mrf.mxu0 }
 0x2ff   : > { %v1038_v56 = vadd.f32 %v1653_v42, %v1037_v55 }
 0x301   : > { %1063 = vst.msk [vmem:[%s1967_s22 + $0x30] sm:$0xff] %vm1056_vm1, %v1038_v56 }
 0x306   : > { %v1039_v57 = vpop.f32.mrf.mxu0 }
 0x307   : > { %v1040_v58 = vadd.f32 %v1653_v42, %v1039_v57 }
 0x309   : > { %1064 = vst.msk [vmem:[%s1967_s22 + $0x38] sm:$0xff] %vm1056_vm1, %v1040_v58 }
 0x30e   : > { %v1042_v59 = vpop.f32.mrf.mxu0 }
 0x30f   : > { %v1043_v60 = vadd.f32 %v1653_v42, %v1042_v59 }
 0x311   : > { %1065 = vst.msk [vmem:[%s1967_s22 + $0x40] sm:$0xff] %vm1056_vm1, %v1043_v60 }
 0x316   : > { %v1044_v61 = vpop.f32.mrf.mxu0 }
 0x317   : > { %v1045_v62 = vadd.f32 %v1653_v42, %v1044_v61 }
 0x319   : > { %1066 = vst.msk [vmem:[%s1967_s22 + $0x48] sm:$0xff] %vm1056_vm1, %v1045_v62 }
 0x31e   : > { %v1047_v63 = vpop.f32.mrf.mxu0 }
 0x31f   : > { %v1048_v0 = vadd.f32 %v1653_v42, %v1047_v63 }
 0x321   : > { %1067 = vst.msk [vmem:[%s1967_s22 + $0x50] sm:$0xff] %vm1056_vm1, %v1048_v0 }
 0x326   : > { %v1049_v1 = vpop.f32.mrf.mxu0 }
 0x327   : > { %v1050_v2 = vadd.f32 %v1653_v42, %v1049_v1 }
 0x329   : > { %1068 = vst.msk [vmem:[%s1967_s22 + $0x58] sm:$0xff] %vm1056_vm1, %v1050_v2 }
 0x32e   : > { %v1052_v3 = vpop.f32.mrf.mxu0 }
 0x32f   : > { %v1053_v4 = vadd.f32 %v1653_v42, %v1052_v3 }
 0x331   : > { %1069 = vst.msk [vmem:[%s1967_s22 + $0x60] sm:$0xff] %vm1056_vm1, %v1053_v4 }
 0x332   : > { %1076 = sbr.rel (!%p1833_p4) target bundleno = 883 (0x373), region = 68 }
 0x336   : > { %v1054_v5 = vpop.f32.mrf.mxu0 }
 0x337   : > { %s2110_s17 = smov (!%p1079_p8, %s1078_s17), 13 }
 0x338   : > { %s1504_s12 = sshll.u32 %s2110_s17, 3 }
 0x339   : > { %p1507_p9 = scmp.eq.s32.totalorder %s1504_s12, 0 }
 0x33a   : > { %1654 = sdivrem.u32 (!%p1507_p9), %s2110_s17, 13 }
 0x33b   : > { %1087 = sbr.rel (%p1507_p9) target bundleno = 883 (0x373), region = 72 }
 0x343   : > { %s2008_s25 = spop.drf %1654 }
 0x344   : > { %s1656_s13 = spop.drf %1654  ;;  %p1508_p10 = scmp.le.s32.totalorder %s2008_s25, 0 }
 0x345   : > { %s2101_s20 = smov (!%p1508_p10), %s2002_s30  ;;  %s2102_s28 = smov (!%p1508_p10), %s1967_s22 }
 0x346   : > { %1292 = sbr.rel (%p1508_p10) target bundleno = 857 (0x359), region = 148  ;;  %s2017_s14 = smov (!%p1508_p10), 0  }
 0x347   : > { %s2019_s15 = smov (!%p1508_p10), 0  }
 0x34b LB: >> { %v1176_v6 = vld [vmem:[%s1722_s28] sm:$0xff]  ;;  %v1178_v7 = vld [vmem:[%s1722_s28 + $0x8] sm:$0xff]  ;;  %v1180_v8 = vld [vmem:[%s1722_s28 + $0x10] sm:$0xff]  ;;  %s1202_s16 = sadd.s32 1, %s1726_s14  ;;  %s1170_s15 = sadd.s32 1, %s1730_s15   ;;  %s1730_s15 = sphi %s2019_s15, %s1170_s15   ;;  %s1726_s14 = sphi %s2017_s14, %s2105_s14   ;;  %s1722_s28 = sphi %s2102_s28, %s2104_s28   ;;  %s1718_s20 = sphi %s2101_s20, %s2103_s20  }
 0x34c   : >> { %1177 = vst [vmem:[%s1718_s20] sm:$0xff] %v1176_v6  ;;  %v1182_v9 = vld [vmem:[%s1722_s28 + $0x18] sm:$0xff]  ;;  %p1203_p11 = scmp.ge.s32.totalorder %s1202_s16, %s2008_s25  ;;  %v1184_v10 = vld [vmem:[%s1722_s28 + $0x20] sm:$0xff]  ;;  %v1186_v11 = vld [vmem:[%s1722_s28 + $0x28] sm:$0xff]  ;;  %p1169_p12 = scmp.ge.s32.totalorder %s1170_s15, %s2008_s25 }
 0x34d   : >> { %1179 = vst [vmem:[%s1718_s20 + $0x8] sm:$0xff] %v1178_v7  ;;  %v1188_v12 = vld [vmem:[%s1722_s28 + $0x30] sm:$0xff]  ;;  %v1190_v13 = vld [vmem:[%s1722_s28 + $0x38] sm:$0xff]  ;;  %v1192_v14 = vld [vmem:[%s1722_s28 + $0x40] sm:$0xff] }
 0x34e   : >> { %1181 = vst [vmem:[%s1718_s20 + $0x10] sm:$0xff] %v1180_v8  ;;  %s2112_s16 = smov (%p1203_p11, %s1202_s16), 0  ;;  %v1194_v15 = vld [vmem:[%s1722_s28 + $0x48] sm:$0xff]  ;;  %v1196_v16 = vld [vmem:[%s1722_s28 + $0x50] sm:$0xff]  ;;  %v1198_v17 = vld [vmem:[%s1722_s28 + $0x58] sm:$0xff] }
 0x34f   : >> { %1183 = vst [vmem:[%s1718_s20 + $0x18] sm:$0xff] %v1182_v9  ;;  %s1205_s19 = smul.u32 104, %s2112_s16  ;;  %v1200_v18 = vld [vmem:[%s1722_s28 + $0x60] sm:$0xff]  ;;  %s2105_s14 = smov %s2112_s16 }
 0x350   : >> { %1185 = vst [vmem:[%s1718_s20 + $0x20] sm:$0xff] %v1184_v10 }
 0x351   : >> { %1187 = vst [vmem:[%s1718_s20 + $0x28] sm:$0xff] %v1186_v11  ;;  %s1207_s23 = scalar_lea.vmem %s1967_s22, %s1205_s19 [#allocation2]   ;;  %s1208_s26 = scalar_lea.vmem %s2002_s30, %s1205_s19  }
 0x352   : >> { %1189 = vst [vmem:[%s1718_s20 + $0x30] sm:$0xff] %v1188_v12  ;;  %s2104_s28 = smov %s1207_s23 }
 0x353   : >> { %1191 = vst [vmem:[%s1718_s20 + $0x38] sm:$0xff] %v1190_v13 }
 0x354   : >> { %1193 = vst [vmem:[%s1718_s20 + $0x40] sm:$0xff] %v1192_v14  ;;  %1172 = sbr.rel (!%p1169_p12) target bundleno = 843 (0x34b), region = 154 }
 0x355   : >> { %1195 = vst [vmem:[%s1718_s20 + $0x48] sm:$0xff] %v1194_v15 }
 0x356   : >> { %1197 = vst [vmem:[%s1718_s20 + $0x50] sm:$0xff] %v1196_v16 }
 0x357   : >> { %1199 = vst [vmem:[%s1718_s20 + $0x58] sm:$0xff] %v1198_v17 }
 0x358   : >> { %1201 = vst [vmem:[%s1718_s20 + $0x60] sm:$0xff] %v1200_v18  ;;  %s2103_s20 = smov %s1208_s26 }
 0x359 PF: > { %1657 = sdivrem.u32 %s2110_s17, 13 }
 0x35a   : > { %s1509_s27 = smul.u32 104, %s2008_s25 }
 0x35c   : > { %s2073_s29 = scalar_lea.vmem %s1967_s22, %s1509_s27 [#allocation2]   ;;  %s1215_s12 = scalar_lea.vmem %s2002_s30, %s1509_s27  }
 0x362   : > { %s1658_s13 = spop.drf %1657 }
 0x363   : > { %s1659_s19 = spop.drf %1657 }
 0x364   : > { %p1511_p13 = scmp.le.s32.totalorder %s1659_s19, 0 }
 0x365   : > { %s1732_s23 = smov (!%p1511_p13), %s1215_s12   ;;  %s1736_s16 = smov (!%p1511_p13), %s2073_s29  }
 0x366   : > { %1306 = sbr.rel (%p1511_p13) target bundleno = 883 (0x373), region = 159  ;;  %s1740_s26 = smov (!%p1511_p13), 0  }
 0x367   : > { %s1744_s15 = smov (!%p1511_p13), 0  }
 0x36b LB: >> { %v1225_v19 = vld [vmem:[%s1738_s16] sm:$0xff]  ;;  %s1227_s22 = sadd.s32 1, %s1742_s26  ;;  %s1219_s15 = sadd.s32 1, %s1746_s15   ;;  %s1746_s15 = sphi %s1744_s15, %s1219_s15   ;;  %s1742_s26 = sphi %s1740_s26, %s1741_s26   ;;  %s1738_s16 = sphi %s1736_s16, %s1232_s16   ;;  %s1734_s23 = sphi %s1732_s23, %s1233_s23  }
 0x36c   : >> { %1226 = vst [vmem:[%s1734_s23] sm:$0xff] %v1225_v19  ;;  %p1228_p0 = scmp.ge.s32.totalorder %s1227_s22, %s1659_s19  ;;  %p1218_p1 = scmp.ge.s32.totalorder %s1219_s15, %s1659_s19 }
 0x36e   : >> { %s2114_s22 = smov (%p1228_p0, %s1227_s22), 0  ;;  %1221 = sbr.rel (!%p1218_p1) target bundleno = 875 (0x36b), region = 165 }
 0x36f   : >> { %s1512_s17 = sshll.u32 %s2114_s22, 3  ;;  %s1741_s26 = smov %s2114_s22  }
 0x370   : >> { %s1232_s16 = scalar_lea.vmem %s2073_s29, %s1512_s17 [#allocation2]   ;;  %s1233_s23 = scalar_lea.vmem %s1215_s12, %s1512_s17  }
 0x373 PF: > { %p18_p2 = scmp.ge.s32.totalorder %s1823_s21, 4   ;;  %s2106_s17 = smov %s1710_s18 }
 0x374   : > { %s2107_s18 = smov %s1831_s24  ;;  %s2108_s19 = smov %s1823_s21 }
 0x375   :  { %20 = sbr.rel (!%p18_p2) target bundleno = 2 (0x2), region = 176 }

</bundles_post_ra>
